<compile_context>
chip_gen: v7x
topology: tpu7x:2x2x1
jax: 0.10.0
libtpu: 0.0.40
codegen_flags: <defaults>
</compile_context>

<pallas_src>
import functools

import jax
import jax.numpy as jnp
from jax import lax
from jax.experimental import pallas as pl
from jax.experimental.pallas import tpu as pltpu


def _build_banded_weights(wa_oihw, wb_oihw, W):
    """Fold both convs, the 3 horizontal taps and C_in into banded matrices.

    Returns band of shape (3, W*C, 2*W*C) with
        band[ky, win*C + ci, j*W*C + wout*C + co] = w_j[co, ci, ky, win - wout + 1]
    (zero outside the 3x3 stencil), so a `left` row flattened as (w, c) matmul'd
    with band[ky] yields the ky-th vertical-tap contribution of conv_a (j=0) and
    conv_b (j=1) for every output (w, c), including padding=1 at the W edges.
    """
    C = wa_oihw.shape[0]
    wt = jnp.stack([wa_oihw, wb_oihw], axis=0)                 # (j, co, ci, ky, kx)
    # S[kx, win, wout] = 1  iff  win == wout + kx - 1
    S = jnp.stack([jnp.eye(W, W, k=1 - kx, dtype=wt.dtype) for kx in range(3)],
                  axis=0)                                      # (kx, win, wout)
    band = jnp.einsum("xvw,joiyx->yvijwo", S, wt)              # (ky, win, ci, j, wout, co)
    return band.reshape(3, W * C, 2 * W * C)


def repair_mask_kernel(left_ref, x_ref, wband_ref, bias_ref, o_ref, *, rows_per_image):
    """Fused conv_a/conv_b + sigmoid/tanh + combine for the whole batch.

    left_ref, x_ref : (B*H, W*C)      image rows, channel-last, batch folded in
    wband_ref       : (3, W*C, 2*W*C) banded weights, one slab per vertical tap
    bias_ref        : (1, 2*W*C)
    o_ref           : (B*H, W*C)
    """
    M, WC = left_ref.shape
    H = rows_per_image

    # Feed the MXU in the input dtype (no pre-dot upcasts); accumulate in f32.
    lhs = left_ref[...]

    # ky = 1 (centre row): no vertical shift.
    acc = jnp.dot(lhs, wband_ref[1], preferred_element_type=jnp.float32)
    acc = acc + bias_ref[...].astype(jnp.float32)

    # ky = 0 / ky = 2: shift rows by +/-1.  Rows that would cross an image
    # boundary (top/bottom padding, or the seam between folded batch images)
    # are zeroed -- in-kernel halo handling instead of a wrapper jnp.pad copy.
    row = lax.broadcasted_iota(jnp.int32, (M, 1), 0)
    zero_row = jnp.zeros((1, WC), lhs.dtype)
    zero = jnp.zeros((), lhs.dtype)

    down = jnp.concatenate([zero_row, lhs[:-1, :]], axis=0)    # row i <- left row i-1
    down = jnp.where(row % H == 0, zero, down)
    acc = acc + jnp.dot(down, wband_ref[0], preferred_element_type=jnp.float32)

    up = jnp.concatenate([lhs[1:, :], zero_row], axis=0)       # row i <- left row i+1
    up = jnp.where(row % H == H - 1, zero, up)
    acc = acc + jnp.dot(up, wband_ref[2], preferred_element_type=jnp.float32)

    conv_a = acc[:, :WC]            # first  W*C lanes = conv_a pre-activation
    conv_b = acc[:, WC:]            # second W*C lanes = conv_b pre-activation
    xv = x_ref[...].astype(jnp.float32)
    out = xv * jax.nn.sigmoid(conv_a) + jnp.tanh(conv_b)
    o_ref[...] = out.astype(o_ref.dtype)


def rfpm_repair_mask(left, x, wa_oihw, ba, wb_oihw, bb):
    """left, x: NCHW float32. Conv weights in PyTorch OIHW layout. Returns NCHW."""
    B, C, H, W = left.shape
    WC = W * C
    M = B * H
    N = 2 * WC

    # Module contract is NCHW; these transposes/reshapes are the only remaining
    # wrapper-side HBM round trips (an NHWC-native pipeline would drop them).
    # No jnp.pad: the halo is handled inside the kernel.
    left2d = jnp.transpose(left, (0, 2, 3, 1)).reshape(M, WC)
    x2d = jnp.transpose(x, (0, 2, 3, 1)).reshape(M, WC)

    wband = _build_banded_weights(wa_oihw, wb_oihw, W)                   # (3, WC, 2*WC)
    bias = jnp.concatenate([jnp.tile(ba, W), jnp.tile(bb, W)])[None, :]  # (1, 2*WC)

    kernel = functools.partial(repair_mask_kernel, rows_per_image=H)

    # Whole problem in a single grid step: B is folded into the matmul M axis,
    # so there is no per-grid-step overhead and the output is one dense slab.
    # TODO(synk): for large images or C >= 128, add an H-strip grid axis with a
    # 1-row halo (v7x 64 MiB VMEM) and switch to the per-tap (H*W,C)@(C,2C)
    # channel-matmul formulation; the banded weight here targets small W*C.
    out2d = pl.pallas_call(
        kernel,
        out_shape=jax.ShapeDtypeStruct((M, WC), x.dtype),
        grid_spec=pltpu.PrefetchScalarGridSpec(
            num_scalar_prefetch=0,
            grid=(1,),
            in_specs=[
                pl.BlockSpec((M, WC), lambda i: (0, 0)),
                pl.BlockSpec((M, WC), lambda i: (0, 0)),
                pl.BlockSpec((3, WC, N), lambda i: (0, 0, 0)),
                pl.BlockSpec((1, N), lambda i: (0, 0)),
            ],
            out_specs=pl.BlockSpec((M, WC), lambda i: (0, 0)),
        ),
    )(left2d, x2d, wband, bias)

    return jnp.transpose(out2d.reshape(B, H, W, C), (0, 3, 1, 2))


def ref_forward(left, x, wa_oihw, ba, wb_oihw, bb):
    """Pure-JAX reference (matches PyTorch Conv2d 'SAME' semantics)."""
    dn = ("NCHW", "OIHW", "NCHW")
    ca = lax.conv_general_dilated(left, wa_oihw, (1, 1), "SAME",
                                  dimension_numbers=dn) + ba.reshape(1, -1, 1, 1)
    cb = lax.conv_general_dilated(left, wb_oihw, (1, 1), "SAME",
                                  dimension_numbers=dn) + bb.reshape(1, -1, 1, 1)
    return x * jax.nn.sigmoid(ca) + jnp.tanh(cb)


if __name__ == "__main__":
    B, C, H, W = 2, 4, 16, 16

    key = jax.random.PRNGKey(0)
    k_left, k_x, k_wa, k_ba, k_wb, k_bb = jax.random.split(key, 6)

    left = jax.random.normal(k_left, (B, C, H, W), jnp.float32)
    x = jax.random.normal(k_x, (B, C, H, W), jnp.float32)

    # Deterministic "init" of the two conv layers (OIHW like PyTorch).
    wa_oihw = 0.1 * jax.random.normal(k_wa, (C, C, 3, 3), jnp.float32)
    ba = 0.1 * jax.random.normal(k_ba, (C,), jnp.float32)
    wb_oihw = 0.1 * jax.random.normal(k_wb, (C, C, 3, 3), jnp.float32)
    bb = 0.1 * jax.random.normal(k_bb, (C,), jnp.float32)

    out = rfpm_repair_mask(left, x, wa_oihw, ba, wb_oihw, bb)
    out = jax.block_until_ready(out)

    ref = ref_forward(left, x, wa_oihw, ba, wb_oihw, bb)
    if not jnp.allclose(out, ref, atol=1e-4, rtol=1e-4):
        raise AssertionError("Pallas kernel output mismatch vs reference")

    print("KERNEL_OK")
</pallas_src>

<mosaic_0001>
module attributes {stable_mosaic.version = 11 : i64} {
  func.func @repair_mask_kernel(%arg0: i32, %arg1: memref<32x64xf32, #tpu.memory_space<vmem>>, %arg2: memref<32x64xf32, #tpu.memory_space<vmem>>, %arg3: memref<3x64x128xf32, #tpu.memory_space<vmem>>, %arg4: memref<1x128xf32, #tpu.memory_space<vmem>>, %arg5: memref<32x64xf32, #tpu.memory_space<vmem>>) attributes {dimension_semantics = [#tpu.dimension_semantics<arbitrary>], iteration_bounds = array<i64: 1>, scalar_prefetch = 0 : i64, scratch_operands = 0 : i64, tpu.core_type = #tpu.core_type<tc>, window_params = [{pipeline_mode = #tpu.pipeline_mode<synchronous>, transform_indices = @transform_0, window_bounds = array<i64: 32, 64>}, {pipeline_mode = #tpu.pipeline_mode<synchronous>, transform_indices = @transform_1, window_bounds = array<i64: 32, 64>}, {pipeline_mode = #tpu.pipeline_mode<synchronous>, transform_indices = @transform_2, window_bounds = array<i64: 3, 64, 128>}, {pipeline_mode = #tpu.pipeline_mode<synchronous>, transform_indices = @transform_3, window_bounds = array<i64: 1, 128>}, {pipeline_mode = #tpu.pipeline_mode<synchronous>, transform_indices = @transform_4, window_bounds = array<i64: 32, 64>}]} {
    %c0 = arith.constant 0 : index
    %c0_0 = arith.constant 0 : index
    %0 = vector.load %arg1[%c0, %c0_0] : memref<32x64xf32, #tpu.memory_space<vmem>>, vector<32x64xf32>
    %c1 = arith.constant 1 : index
    %c0_1 = arith.constant 0 : index
    %c0_2 = arith.constant 0 : index
    %1 = vector.load %arg3[%c1, %c0_1, %c0_2] : memref<3x64x128xf32, #tpu.memory_space<vmem>>, vector<1x64x128xf32>
    %2 = vector.shape_cast %1 : vector<1x64x128xf32> to vector<64x128xf32>
    %cst = arith.constant dense<0.000000e+00> : vector<32x128xf32>
    %3 = tpu.matmul %0, %2, %cst {dimension_numbers = #tpu.dot_dimension_numbers<[1], [0], [0], [1], [0, 0, 1, 1], [], []>} : vector<32x64xf32>, vector<64x128xf32>, vector<32x128xf32> -> vector<32x128xf32>
    %c0_3 = arith.constant 0 : index
    %c0_4 = arith.constant 0 : index
    %4 = vector.load %arg4[%c0_3, %c0_4] : memref<1x128xf32, #tpu.memory_space<vmem>>, vector<1x128xf32>
    %5 = vector.broadcast %4 : vector<1x128xf32> to vector<32x128xf32>
    %6 = arith.addf %3, %5 : vector<32x128xf32>
    %7 = tpu.iota {dimensions = array<i32: 0>} : vector<32x1xi32>
    %cst_5 = arith.constant 0.000000e+00 : f32
    %8 = vector.broadcast %cst_5 : f32 to vector<1x64xf32>
    %9 = vector.extract_strided_slice %0 {offsets = [0, 0], sizes = [31, 64], strides = [1, 1]} : vector<32x64xf32> to vector<31x64xf32>
    %10 = tpu.concatenate %8, %9 in 0 : vector<1x64xf32>, vector<31x64xf32> -> vector<32x64xf32>
    %c16_i32 = arith.constant 16 : i32
    %c0_i32 = arith.constant 0 : i32
    %11 = arith.cmpi eq, %c16_i32, %c0_i32 : i32
    %c1_i32 = arith.constant 1 : i32
    %12 = arith.select %11, %c1_i32, %c16_i32 : i32
    %13 = vector.broadcast %12 : i32 to vector<32x1xi32>
    %14 = arith.remsi %7, %13 : vector<32x1xi32>
    %c0_i32_6 = arith.constant 0 : i32
    %15 = vector.broadcast %c0_i32_6 : i32 to vector<32x1xi32>
    %16 = arith.cmpi ne, %14, %15 : vector<32x1xi32>
    %c0_i32_7 = arith.constant 0 : i32
    %17 = vector.broadcast %c0_i32_7 : i32 to vector<32x1xi32>
    %18 = arith.cmpi slt, %14, %17 : vector<32x1xi32>
    %c0_i32_8 = arith.constant 0 : i32
    %19 = arith.cmpi slt, %12, %c0_i32_8 : i32
    %20 = vector.broadcast %19 : i1 to vector<32x1xi1>
    %21 = vector.broadcast %20 : vector<32x1xi1> to vector<32x1xi1>
    %22 = arith.xori %18, %21 : vector<32x1xi1>
    %23 = arith.andi %22, %16 : vector<32x1xi1>
    %24 = vector.broadcast %12 : i32 to vector<32x1xi32>
    %25 = arith.addi %14, %24 : vector<32x1xi32>
    %26 = arith.select %23, %25, %14 : vector<32x1xi1>, vector<32x1xi32>
    %c0_i32_9 = arith.constant 0 : i32
    %27 = vector.broadcast %c0_i32_9 : i32 to vector<32x1xi32>
    %28 = arith.cmpi eq, %26, %27 : vector<32x1xi32>
    %cst_10 = arith.constant 0.000000e+00 : f32
    %29 = vector.shape_cast %28 : vector<32x1xi1> to vector<32x1xi1>
    %30 = vector.broadcast %29 : vector<32x1xi1> to vector<32x64xi1>
    %31 = vector.broadcast %cst_10 : f32 to vector<32x64xf32>
    %32 = arith.select %30, %31, %10 : vector<32x64xi1>, vector<32x64xf32>
    %c0_11 = arith.constant 0 : index
    %c0_12 = arith.constant 0 : index
    %c0_13 = arith.constant 0 : index
    %33 = vector.load %arg3[%c0_11, %c0_12, %c0_13] : memref<3x64x128xf32, #tpu.memory_space<vmem>>, vector<1x64x128xf32>
    %34 = vector.shape_cast %33 : vector<1x64x128xf32> to vector<64x128xf32>
    %cst_14 = arith.constant dense<0.000000e+00> : vector<32x128xf32>
    %35 = tpu.matmul %32, %34, %cst_14 {dimension_numbers = #tpu.dot_dimension_numbers<[1], [0], [0], [1], [0, 0, 1, 1], [], []>} : vector<32x64xf32>, vector<64x128xf32>, vector<32x128xf32> -> vector<32x128xf32>
    %36 = arith.addf %6, %35 : vector<32x128xf32>
    %37 = vector.extract_strided_slice %0 {offsets = [1, 0], sizes = [31, 64], strides = [1, 1]} : vector<32x64xf32> to vector<31x64xf32>
    %38 = tpu.concatenate %37, %8 in 0 : vector<31x64xf32>, vector<1x64xf32> -> vector<32x64xf32>
    %c16_i32_15 = arith.constant 16 : i32
    %c0_i32_16 = arith.constant 0 : i32
    %39 = arith.cmpi eq, %c16_i32_15, %c0_i32_16 : i32
    %c1_i32_17 = arith.constant 1 : i32
    %40 = arith.select %39, %c1_i32_17, %c16_i32_15 : i32
    %41 = vector.broadcast %40 : i32 to vector<32x1xi32>
    %42 = arith.remsi %7, %41 : vector<32x1xi32>
    %c0_i32_18 = arith.constant 0 : i32
    %43 = vector.broadcast %c0_i32_18 : i32 to vector<32x1xi32>
    %44 = arith.cmpi ne, %42, %43 : vector<32x1xi32>
    %c0_i32_19 = arith.constant 0 : i32
    %45 = vector.broadcast %c0_i32_19 : i32 to vector<32x1xi32>
    %46 = arith.cmpi slt, %42, %45 : vector<32x1xi32>
    %c0_i32_20 = arith.constant 0 : i32
    %47 = arith.cmpi slt, %40, %c0_i32_20 : i32
    %48 = vector.broadcast %47 : i1 to vector<32x1xi1>
    %49 = vector.broadcast %48 : vector<32x1xi1> to vector<32x1xi1>
    %50 = arith.xori %46, %49 : vector<32x1xi1>
    %51 = arith.andi %50, %44 : vector<32x1xi1>
    %52 = vector.broadcast %40 : i32 to vector<32x1xi32>
    %53 = arith.addi %42, %52 : vector<32x1xi32>
    %54 = arith.select %51, %53, %42 : vector<32x1xi1>, vector<32x1xi32>
    %c15_i32 = arith.constant 15 : i32
    %55 = vector.broadcast %c15_i32 : i32 to vector<32x1xi32>
    %56 = arith.cmpi eq, %54, %55 : vector<32x1xi32>
    %cst_21 = arith.constant 0.000000e+00 : f32
    %57 = vector.shape_cast %56 : vector<32x1xi1> to vector<32x1xi1>
    %58 = vector.broadcast %57 : vector<32x1xi1> to vector<32x64xi1>
    %59 = vector.broadcast %cst_21 : f32 to vector<32x64xf32>
    %60 = arith.select %58, %59, %38 : vector<32x64xi1>, vector<32x64xf32>
    %c2 = arith.constant 2 : index
    %c0_22 = arith.constant 0 : index
    %c0_23 = arith.constant 0 : index
    %61 = vector.load %arg3[%c2, %c0_22, %c0_23] : memref<3x64x128xf32, #tpu.memory_space<vmem>>, vector<1x64x128xf32>
    %62 = vector.shape_cast %61 : vector<1x64x128xf32> to vector<64x128xf32>
    %cst_24 = arith.constant dense<0.000000e+00> : vector<32x128xf32>
    %63 = tpu.matmul %60, %62, %cst_24 {dimension_numbers = #tpu.dot_dimension_numbers<[1], [0], [0], [1], [0, 0, 1, 1], [], []>} : vector<32x64xf32>, vector<64x128xf32>, vector<32x128xf32> -> vector<32x128xf32>
    %64 = arith.addf %36, %63 : vector<32x128xf32>
    %65 = vector.extract_strided_slice %64 {offsets = [0, 0], sizes = [32, 64], strides = [1, 1]} : vector<32x128xf32> to vector<32x64xf32>
    %66 = vector.extract_strided_slice %64 {offsets = [0, 64], sizes = [32, 64], strides = [1, 1]} : vector<32x128xf32> to vector<32x64xf32>
    %c0_25 = arith.constant 0 : index
    %c0_26 = arith.constant 0 : index
    %67 = vector.load %arg2[%c0_25, %c0_26] : memref<32x64xf32, #tpu.memory_space<vmem>>, vector<32x64xf32>
    %68 = arith.negf %65 : vector<32x64xf32>
    %69 = math.exp %68 : vector<32x64xf32>
    %cst_27 = arith.constant 1.000000e+00 : f32
    %70 = vector.broadcast %cst_27 : f32 to vector<32x64xf32>
    %71 = arith.addf %70, %69 : vector<32x64xf32>
    %72 = arith.divf %70, %71 : vector<32x64xf32>
    %73 = arith.mulf %67, %72 : vector<32x64xf32>
    %74 = math.tanh %66 : vector<32x64xf32>
    %75 = arith.addf %73, %74 : vector<32x64xf32>
    %c0_28 = arith.constant 0 : index
    %c0_29 = arith.constant 0 : index
    %76 = vector.load %arg5[%c0_28, %c0_29] : memref<32x64xf32, #tpu.memory_space<vmem>>, vector<32x64xf32>
    tpu.vector_store %arg5[%c0_28, %c0_29], %75 {strides = array<i32>} : memref<32x64xf32, #tpu.memory_space<vmem>>, vector<32x64xf32>,
    return
  }
  func.func @transform_0(%arg0: i32) -> (i32, i32) {
    %c0_i32 = arith.constant 0 : i32
    %c0_i32_0 = arith.constant 0 : i32
    %c0_i32_1 = arith.constant 0 : i32
    return %c0_i32, %c0_i32_0 : i32, i32
  }
  func.func @transform_1(%arg0: i32) -> (i32, i32) {
    %c0_i32 = arith.constant 0 : i32
    %c0_i32_0 = arith.constant 0 : i32
    %c0_i32_1 = arith.constant 0 : i32
    return %c0_i32, %c0_i32_0 : i32, i32
  }
  func.func @transform_2(%arg0: i32) -> (i32, i32, i32) {
    %c0_i32 = arith.constant 0 : i32
    %c0_i32_0 = arith.constant 0 : i32
    %c0_i32_1 = arith.constant 0 : i32
    %c0_i32_2 = arith.constant 0 : i32
    return %c0_i32, %c0_i32_0, %c0_i32_1 : i32, i32, i32
  }
  func.func @transform_3(%arg0: i32) -> (i32, i32) {
    %c0_i32 = arith.constant 0 : i32
    %c0_i32_0 = arith.constant 0 : i32
    %c0_i32_1 = arith.constant 0 : i32
    return %c0_i32, %c0_i32_0 : i32, i32
  }
  func.func @transform_4(%arg0: i32) -> (i32, i32) {
    %c0_i32 = arith.constant 0 : i32
    %c0_i32_0 = arith.constant 0 : i32
    %c0_i32_1 = arith.constant 0 : i32
    return %c0_i32, %c0_i32_0 : i32, i32
  }
}

</mosaic_0001>

<bundles_post_ra>
// kernel: tpu_custom_call.1
= control target key start
LH: loop header
LB: loop body
LE: loop exit
PB: predicated region body
PF: predicated region fallthrough
CT: control target
= control target key end

     0   :  { %9 = vsyncpa [#allocation3], 0  ;;  %s1050_s0 = inlined_call_operand.hbm [shape: f32[32,64], index: 0, kind: input, shape index: {}]   ;;  %s1051_s1 = inlined_call_operand.hbm [shape: f32[32,64], index: 1, kind: input, shape index: {}]   ;;  %s1052_s2 = inlined_call_operand.hbm [shape: f32[3,64,128], index: 2, kind: input, shape index: {}]   ;;  %s1053_s3 = inlined_call_operand.vmem [shape: f32[1,128], index: 3, kind: input, shape index: {}]   ;;  %s1054_s4 = inlined_call_operand.hbm [shape: f32[32,64], index: 4, kind: output, shape index: {}]  }
   0x1   :  { %10 = vsyncpa [#allocation6], 0 }
   0x2   :  { %11 = vsyncpa [#allocation4], 0  ;;  %s897_s15 = smov [#allocation5]   ;;  %s898_s17 = smov [#allocation2]  }
   0x3   :  { %s29_s16 = sshll.u32 %s897_s15, 4  ;;  %s17_s18 = sshll.u32 %s898_s17, 4  ;;  %s30_s16 = int_to_ptr.vmem [resolvable:$true] %s29_s16  ;;  %s929_s18 = int_to_ptr.vmem [resolvable:$true] %s17_s18 }
   0x4   :  { %s803_s21 = scalar_lea.hbm %s1051_s1, 512 }
   0x5   :  { %p804_p0 = scmp.ne.s32.totalorder %s1051_s1, %s803_s21  ;;  %p807_p1 = scmp.lt.u32.totalorder %s803_s21, %s1051_s1 }
   0x7   :  { %p809_p2 = pnand %p807_p1, %p804_p0 }
   0x9   :  { %812 = shalt.err (!%p809_p2)
}
   0xa   :  { %s813_s26 = scalar_lea.vmem %s30_s16, 512  ;;  %p818_p4 = scmp.lt.s32.totalorder %s30_s16, %s30_s16 }
   0xb   :  { %p814_p3 = scmp.ne.s32.totalorder %s30_s16, %s813_s26  ;;  %p819_p5 = scmp.lt.s32.totalorder %s813_s26, %s813_s26 }
   0xd   :  { %p820_p6 = por %p819_p5, %p818_p4 }
   0xf   :  { %p821_p7 = pnand %p820_p6, %p814_p3 }
  0x11   :  { %824 = shalt.err (!%p821_p7)
}
  0x12   :  { %s899_s27 = smov 128   ;;  %s900_s28 = smov 8  }
  0x13   :  { %35 = dma.hbm_to_vmem [thread:$0]  %s1051_s1, 512, %s30_s16, [#allocation6], %s899_s27, %s899_s27, %s900_s28  }
  0x14   :  { %s825_s7 = scalar_lea.hbm %s1050_s0, 512 }
  0x15   :  { %p826_p8 = scmp.ne.s32.totalorder %s1050_s0, %s825_s7  ;;  %p829_p9 = scmp.lt.u32.totalorder %s825_s7, %s1050_s0 }
  0x17   :  { %p831_p10 = pnand %p829_p9, %p826_p8 }
  0x19   :  { %834 = shalt.err (!%p831_p10)
}
  0x1a   :  { %s835_s12 = scalar_lea.vmem %s929_s18, 512  ;;  %p840_p12 = scmp.lt.s32.totalorder %s929_s18, %s929_s18 }
  0x1b   :  { %p836_p11 = scmp.ne.s32.totalorder %s929_s18, %s835_s12  ;;  %p841_p13 = scmp.lt.s32.totalorder %s835_s12, %s835_s12 }
  0x1d   :  { %p842_p0 = por %p841_p13, %p840_p12 }
  0x1f   :  { %p843_p1 = pnand %p842_p0, %p836_p11 }
  0x21   :  { %846 = shalt.err (!%p843_p1)
}
  0x22   :  { %23 = dma.hbm_to_vmem [thread:$0]  %s1050_s0, 512, %s929_s18, [#allocation3], %s899_s27, %s899_s27, %s900_s28  }
  0x23   :  { %s901_s14 = smov [#allocation7]   ;;  %s847_s19 = scalar_lea.hbm %s1052_s2, 3072 }
  0x24   :  { %s41_s15 = sshll.u32 %s901_s14, 4  ;;  %p848_p2 = scmp.ne.s32.totalorder %s1052_s2, %s847_s19  ;;  %s42_s15 = int_to_ptr.vmem [resolvable:$true] %s41_s15 }
  0x25   :  { %p851_p3 = scmp.lt.u32.totalorder %s847_s19, %s1052_s2 }
  0x27   :  { %p853_p4 = pnand %p851_p3, %p848_p2 }
  0x29   :  { %856 = shalt.err (!%p853_p4)
}
  0x2a   :  { %s857_s24 = scalar_lea.vmem %s42_s15, 3072  ;;  %p862_p6 = scmp.lt.s32.totalorder %s42_s15, %s42_s15 }
  0x2b   :  { %p858_p5 = scmp.ne.s32.totalorder %s42_s15, %s857_s24  ;;  %p863_p7 = scmp.lt.s32.totalorder %s857_s24, %s857_s24 }
  0x2d   :  { %p864_p8 = por %p863_p7, %p862_p6 }
  0x2f   :  { %p865_p9 = pnand %p864_p8, %p858_p5 }
  0x31   :  { %868 = shalt.err (!%p865_p9)
}
  0x32   :  { %47 = dma.hbm_to_vmem [thread:$0]  %s1052_s2, 3072, %s42_s15, [#allocation6], %s899_s27, %s899_s27, %s900_s28  }
  0x33   :  { %891 = dma.done.wait [#allocation3], 512  }
  0x34   :  { %892 = vsyncadd [#allocation3], 4294966784 }
  0x35   :  { %893 = dma.done.wait [#allocation6], 3584  }
  0x36   :  { %894 = vsyncadd [#allocation6], 4294963712  ;;  %v177_v0 = vlaneseq  ;;  %v64_v2 = vld [vmem:[#allocation7 + $0x40] sm:$0xff]  ;;  %v65_v3 = vld [vmem:[#allocation7 + $0x48] sm:$0xff]  ;;  %vm79_vm0 = vcmask 523264   ;;  %vm182_vm1 = vcmask 1040384  }
  0x37   :  { %v259_v4 = vld [vmem:[#allocation7] sm:$0xff]  ;;  %v704_v5 = vpack.c.bf16 %v65_v3, %v64_v2  ;;  %v260_v6 = vld [vmem:[#allocation7 + $0x8] sm:$0xff]  ;;  %v66_v7 = vld [vmem:[#allocation7 + $0x50] sm:$0xff]  ;;  %vm368_vm4 = vcmask 1046528   ;;  %s903_s26 = smov [#allocation8]  }
  0x38   :  { %v981_v1 = vshrl.u32 %v177_v0, 7  ;;  %v67_v8 = vld [vmem:[#allocation7 + $0x58] sm:$0xff]  ;;  %v720_v9 = vpack.c.bf16 %v260_v6, %v259_v4  ;;  %v261_v11 = vld [vmem:[#allocation7 + $0x10] sm:$0xff]  ;;  %v68_v13 = vld [vmem:[#allocation7 + $0x60] sm:$0xff]  ;;  %s572_s29 = sshll.u32 %s903_s26, 4  ;;  %s573_s29 = int_to_ptr.vmem [resolvable:$true] %s572_s29 }
  0x39   :  { %v708_v10 = vpack.c.bf16 %v67_v8, %v66_v7  ;;  %v262_v12 = vld [vmem:[#allocation7 + $0x18] sm:$0xff]  ;;  %705 = vmatprep.subr.bf16.mxu1 %v704_v5  ;;  %v69_v15 = vld [vmem:[#allocation7 + $0x68] sm:$0xff]  ;;  %v263_v16 = vld [vmem:[#allocation7 + $0x20] sm:$0xff]  ;;  %s869_s30 = scalar_lea.vmem %s573_s29, 512  ;;  %p874_p11 = scmp.lt.s32.totalorder %s573_s29, %s573_s29 }
  0x3a   :  { %v724_v14 = vpack.c.bf16 %v262_v12, %v261_v11  ;;  %v264_v17 = vld [vmem:[#allocation7 + $0x28] sm:$0xff]  ;;  %v199_v18 = vand.u32 15, %v981_v1  ;;  %721 = vmatprep.subr.bf16.mxu0 %v720_v9  ;;  %707 = vmatpush3.bf16.msra.mxu1 %v704_v5  ;;  %v712_v19 = vpack.c.bf16 %v69_v15, %v68_v13  ;;  %v984_v20 = vld [vmem:[#allocation2] sm:$0xff]  ;;  %v70_v22 = vld [vmem:[#allocation7 + $0x70] sm:$0xff]  ;;  %v180_v27 = vadd.s32 16, %v981_v1  ;;  %p870_p10 = scmp.ne.s32.totalorder %s573_s29, %s869_s30  ;;  %p875_p12 = scmp.lt.s32.totalorder %s869_s30, %s869_s30 }
  0x3b   :  { %723 = vmatpush3.bf16.msra.mxu0 %v720_v9  ;;  %709 = vmatprep.subr.bf16.mxu1 %v708_v10  ;;  %v728_v21 = vpack.c.bf16 %v264_v17, %v263_v16  ;;  %v71_v23 = vld [vmem:[#allocation7 + $0x78] sm:$0xff]  ;;  %v265_v24 = vld [vmem:[#allocation7 + $0x30] sm:$0xff]  ;;  %v183_v26 = vrot.slane %v984_v20, 7  ;;  %v990_v29 = vld [vmem:[#allocation2 + $0x8] sm:$0xff]  ;;  %v369_v50 = vrot.slane %v984_v20, 1  ;;  %v181_v57 = vadd.s32 24, %v981_v1 }
  0x3c   :  { %725 = vmatprep.subr.bf16.mxu0 %v724_v14  ;;  %654 = vmatprep.mubr.msk.f32.mxu1 %vm79_vm0, %v984_v20  ;;  %v266_v25 = vld [vmem:[#allocation7 + $0x38] sm:$0xff]  ;;  %vm243_vm2 = vcmp.eq.s32.totalorder %v199_v18, 0  ;;  %v716_v28 = vpack.c.bf16 %v71_v23, %v70_v22  ;;  %v398_v33 = vld [vmem:[#allocation7 + $0x80] sm:$0xff]  ;;  %v399_v34 = vld [vmem:[#allocation7 + $0x88] sm:$0xff]  ;;  %v213_v36 = vand.u32 15, %v180_v27  ;;  %v184_v37 = vrot.slane %v990_v29, 7  ;;  %p876_p13 = por %p875_p12, %p874_p11 }
  0x3d   :  { %v194_v30 = vsel %vm182_vm1, 0.0, %v183_v26  ;;  %v732_v31 = vpack.c.bf16 %v266_v25, %v265_v24  ;;  %v993_v35 = vld [vmem:[#allocation2 + $0x10] sm:$0xff]  ;;  %v736_v38 = vpack.c.bf16 %v399_v34, %v398_v33  ;;  %v401_v41 = vld [vmem:[#allocation7 + $0x98] sm:$0xff]  ;;  %v402_v48 = vld [vmem:[#allocation7 + $0xa0] sm:$0xff]  ;;  %v370_v51 = vrot.slane %v990_v29, 1 }
  0x3e   :  { %711 = vmatpush3.bf16.msra.mxu1 %v708_v10  ;;  %v255_v32 = vsel %vm243_vm2, 0.0, %v194_v30  ;;  %v186_v39 = vrot.slane %v993_v35, 7  ;;  %v400_v40 = vld [vmem:[#allocation7 + $0x90] sm:$0xff]  ;;  %v62_v42 = vld [vmem:[#allocation2 + $0x18] sm:$0xff]  ;;  %vm998_vm3 = vcmp.eq.s32.totalorder %v213_v36, 0  ;;  %v185_v44 = vsel %vm182_vm1, %v183_v26, %v184_v37  ;;  %v403_v49 = vld [vmem:[#allocation7 + $0xa8] sm:$0xff]  ;;  %p877_p0 = pnand %p876_p13, %p870_p10 }
  0x3f   :  { %727 = vmatpush3.bf16.msra.mxu0 %v724_v14  ;;  %713 = vmatprep.subr.bf16.mxu1 %v712_v19  ;;  %v740_v45 = vpack.c.bf16 %v401_v41, %v400_v40  ;;  %v188_v46 = vrot.slane %v62_v42, 7  ;;  %v372_v52 = vrot.slane %v993_v35, 1  ;;  %v374_v53 = vrot.slane %v62_v42, 1  ;;  %v404_v58 = vld [vmem:[#allocation7 + $0xb0] sm:$0xff]  ;;  %v405_v59 = vld [vmem:[#allocation7 + $0xb8] sm:$0xff] }
  0x40   :  { %729 = vmatprep.subr.bf16.mxu0 %v728_v21  ;;  %676 = vmatprep.mubr.msk.f32.mxu0 %vm79_vm0, %v255_v32  ;;  %v187_v47 = vsel %vm182_vm1, %v184_v37, %v186_v39  ;;  %v744_v55 = vpack.c.bf16 %v403_v49, %v402_v48  ;;  %v179_v60 = vadd.s32 8, %v981_v1  ;;  %v371_v61 = vsel %vm368_vm4, %v369_v50, %v370_v51  ;;  %v585_v8 = vld [vmem:[%s1053_s3] ss:$0 sm:$0xff]  ;;  %s902_s3 = smov 64   ;;  %v508_v50 = vld [vmem:[#allocation5 + $0x8] sm:$0xff] }
  0x41   :  { %v257_v54 = vsel %vm998_vm3, 0.0, %v187_v47  ;;  %v189_v56 = vsel %vm182_vm1, %v186_v39, %v188_v46  ;;  %v375_v62 = vsel %vm368_vm4, %v372_v52, %v374_v53  ;;  %v748_v63 = vpack.c.bf16 %v405_v59, %v404_v58  ;;  %v509_v46 = vld [vmem:[#allocation5 + $0x10] sm:$0xff] }
  0x42   :  { %715 = vmatpush3.bf16.msra.mxu1 %v712_v19  ;;  %v220_v0 = vand.u32 15, %v181_v57  ;;  %v206_v2 = vand.u32 15, %v179_v60  ;;  %v380_v1 = vsel %vm368_vm4, %v374_v53, 0.0  ;;  %v373_v3 = vsel %vm368_vm4, %v370_v51, %v372_v52 }
  0x43   :  { %731 = vmatpush3.bf16.msra.mxu0 %v728_v21  ;;  %717 = vmatprep.subr.bf16.mxu1 %v716_v28 }
  0x44   :  { %733 = vmatprep.subr.bf16.mxu0 %v732_v31  ;;  %vm384_vm5 = vcmp.eq.s32.totalorder %v220_v0, 15  ;;  %vm382_vm6 = vcmp.eq.s32.totalorder %v206_v2, 15 }
  0x45   :  { %v396_v4 = vsel %vm384_vm5, 0.0, %v380_v1  ;;  %v394_v5 = vsel %vm382_vm6, 0.0, %v373_v3 }
  0x46   :  { %719 = vmatpush3.bf16.msra.mxu1 %v716_v28 }
  0x47   :  { %735 = vmatpush3.bf16.msra.mxu0 %v732_v31  ;;  %752 = vmatprep.subr.bf16.mxu1 %v736_v38 }
  0x48   :  { %737 = vmatprep.subr.bf16.mxu0 %v736_v38 }
  0x49   :  { %655 = vmatmul.mubr.msk.f32.vlgmr.msra.gmra.mrb[0].mxu1 %vm79_vm0, %v990_v29 }
  0x4a   :  { %677 = vmatmul.mubr.msk.f32.vlgmr.msra.gmra.mrb[0].mxu0 %vm79_vm0, %v185_v44  ;;  %756 = vmatpush3.bf16.msra.mxu1 %v736_v38  ;;  %v507_v44 = vld [vmem:[#allocation5] sm:$0xff] }
  0x4b   :  { %739 = vmatpush3.bf16.msra.mxu0 %v736_v38  ;;  %753 = vmatprep.subr.bf16.mxu1 %v740_v45 }
  0x4c   :  { %741 = vmatprep.subr.bf16.mxu0 %v740_v45  ;;  %657 = vmatprep.mubr.msk.f32.mxu1 %vm79_vm0, %v993_v35 }
  0x4d   :  { %658 = vmatmul.mubr.msk.f32.gmra.mrb[2].mxu1 %vm79_vm0, %v62_v42  ;;  %679 = vmatprep.mubr.msk.f32.mxu0 %vm79_vm0, %v257_v54 }
  0x4e   :  { %757 = vmatpush3.bf16.msra.mxu1 %v740_v45  ;;  %680 = vmatmul.mubr.msk.f32.gmra.mrb[2].mxu0 %vm79_vm0, %v189_v56 }
  0x4f   :  { %743 = vmatpush3.bf16.msra.mxu0 %v740_v45  ;;  %754 = vmatprep.subr.bf16.mxu1 %v744_v55 }
  0x50   :  { %745 = vmatprep.subr.bf16.mxu0 %v744_v55  ;;  %698 = vmatprep.mubr.msk.f32.mxu0 %vm79_vm0, %v371_v61 }
  0x51   :  { %701 = vmatprep.mubr.msk.f32.mxu1 %vm79_vm0, %v375_v62 }
  0x52   :  { %758 = vmatpush3.bf16.msra.mxu1 %v744_v55 }
  0x53   :  { %747 = vmatpush3.bf16.msra.mxu0 %v744_v55  ;;  %755 = vmatprep.subr.bf16.mxu1 %v748_v63  ;;  %v510_v55 = vld [vmem:[#allocation5 + $0x18] sm:$0xff] }
  0x54   :  { %749 = vmatprep.subr.bf16.mxu0 %v748_v63 }
  0x56   :  { %759 = vmatpush3.bf16.msra.mxu1 %v748_v63 }
  0x57   :  { %751 = vmatpush3.bf16.msra.mxu0 %v748_v63 }
  0x59   :  { %702 = vmatmul.mubr.msk.f32.vlgmr.msra.gmra.mrb[4].mxu1 %vm79_vm0, %v396_v4 }
  0x5a   :  { %699 = vmatmul.mubr.msk.f32.vlgmr.msra.gmra.mrb[0].mxu0 %vm79_vm0, %v394_v5 }
 0x11c   :  { %v656_v6 = vpop.f32.mrb[0].mxu1 }
 0x11d   :  { %v158_v7 = vpop.f32.mrb[1].mxu1  ;;  %v164_v17 = vadd.f32 %v656_v6, %v585_v8 }
 0x11e   :  { %v159_v19 = vadd.f32 %v585_v8, %v158_v7 }
 0x120   :  { %v659_v9 = vpop.f32.mrb[2].mxu1 }
 0x121   :  { %v174_v10 = vadd.f32 %v659_v9, %v585_v8  ;;  %v168_v11 = vpop.f32.mrb[3].mxu1  ;;  %v681_v12 = vpop.f32.mrb[2].mxu0 }
 0x122   :  { %v169_v13 = vadd.f32 %v585_v8, %v168_v11  ;;  %v355_v14 = vpop.f32.mrb[3].mxu0 }
 0x123   :  { %v367_v15 = vadd.f32 %v681_v12, %v174_v10 }
 0x124   :  { %v366_v16 = vadd.f32 %v355_v14, %v169_v13 }
 0x12c   :  { %v703_v18 = vpop.f32.mrb[4].mxu1 }
 0x12d   :  { %v700_v20 = vpop.f32.mrb[0].mxu0  ;;  %v506_v21 = vadd.f32 %v703_v18, %v367_v15  ;;  %v494_v22 = vpop.f32.mrb[5].mxu1 }
 0x12e   :  { %v761_v23 = vadd.f32 %v700_v20, %v164_v17  ;;  %v484_v24 = vpop.f32.mrb[1].mxu0  ;;  %v505_v25 = vadd.f32 %v494_v22, %v366_v16 }
 0x12f   :  { %v763_v26 = vadd.f32 %v484_v24, %v159_v19  ;;  %v601_v34 = vmul.f32 -1.442695, %v506_v21 }
 0x130   :  { %v600_v32 = vmul.f32 -1.442695, %v505_v25  ;;  %v599_v33 = vmul.f32 -1.442695, %v761_v23 }
 0x131   :  { %779 = vtanh.f32 %v763_v26  ;;  %v598_v31 = vmul.f32 -1.442695, %v763_v26 }
 0x132   :  { %781 = vtanh.f32 %v505_v25 }
 0x133   :  { %783 = vtanh.f32 %v761_v23 }
 0x134   :  { %785 = vtanh.f32 %v506_v21 }
 0x135   :  { %787 = vpow2.f32 %v598_v31 }
 0x136   :  { %789 = vpow2.f32 %v600_v32 }
 0x137   :  { %791 = vpow2.f32 %v599_v33 }
 0x138   :  { %793 = vpow2.f32 %v601_v34 }
 0x13b   :  { %v780_v27 = vpop.eup %779 }
 0x13c   :  { %547 = vrot.lane.b32.xlu0 %v780_v27, %s902_s3  ;;  %v782_v28 = vpop.eup %781 }
 0x13d   :  { %551 = vrot.lane.b32.xlu1 %v782_v28, %s902_s3  ;;  %v784_v29 = vpop.eup %783 }
 0x13e   :  { %v786_v30 = vpop.eup %785 }
 0x13f   :  { %v788_v35 = vpop.eup %787 }
 0x140   :  { %549 = vrot.lane.b32.xlu0 %v784_v29, %s902_s3  ;;  %v790_v36 = vpop.eup %789  ;;  %v523_v37 = vadd.f32 1.0, %v788_v35 }
 0x141   :  { %553 = vrot.lane.b32.xlu1 %v786_v30, %s902_s3  ;;  %v792_v38 = vpop.eup %791  ;;  %v525_v39 = vadd.f32 1.0, %v790_v36 }
 0x142   :  { %v794_v40 = vpop.eup %793  ;;  %v524_v41 = vadd.f32 1.0, %v792_v38  ;;  %795 = vrcp.f32 %v523_v37 }
 0x143   :  { %v526_v42 = vadd.f32 1.0, %v794_v40  ;;  %797 = vrcp.f32 %v525_v39 }
 0x144   :  { %799 = vrcp.f32 %v524_v41 }
 0x145   :  { %801 = vrcp.f32 %v526_v42 }
 0x14c   :  { %v796_v43 = vpop.eup %795 }
 0x14d   :  { %v798_v45 = vpop.eup %797  ;;  %v535_v47 = vmul.f32 %v796_v43, %v507_v44 }
 0x14e   :  { %v800_v48 = vpop.eup %799  ;;  %v537_v51 = vmul.f32 %v798_v45, %v509_v46 }
 0x14f   :  { %v802_v53 = vpop.eup %801  ;;  %v536_v57 = vmul.f32 %v800_v48, %v508_v50 }
 0x150   :  { %v538_v59 = vmul.f32 %v802_v53, %v510_v55 }
 0x1ae   :  { %v548_v49 = vpop.permute.xlu0 %547 }
 0x1af   :  { %v559_v52 = vadd.f32 %v548_v49, %v535_v47  ;;  %v552_v54 = vpop.permute.xlu1 %551 }
 0x1b0   :  { %v561_v56 = vadd.f32 %v552_v54, %v537_v51 }
 0x1b1   :  { %563 = vst.msk [vmem:[#allocation8] sm:$0xff] %vm79_vm0, %v559_v52 }
 0x1b2   :  { %v550_v58 = vpop.permute.xlu0 %549  ;;  %565 = vst.msk [vmem:[#allocation8 + $0x10] sm:$0xff] %vm79_vm0, %v561_v56 }
 0x1b3   :  { %v560_v60 = vadd.f32 %v550_v58, %v536_v57  ;;  %v554_v61 = vpop.permute.xlu1 %553 }
 0x1b4   :  { %v562_v62 = vadd.f32 %v554_v61, %v538_v59 }
 0x1b5   :  { %564 = vst.msk [vmem:[#allocation8 + $0x8] sm:$0xff] %vm79_vm0, %v560_v60 }
 0x1b6   :  { %566 = vst.msk [vmem:[#allocation8 + $0x18] sm:$0xff] %vm79_vm0, %v562_v62 }
 0x1b7   :  { %880 = shalt.err (!%p877_p0)
}
 0x1b8   :  { %s881_s7 = scalar_lea.hbm %s1054_s4, 512 }
 0x1b9   :  { %p882_p1 = scmp.ne.s32.totalorder %s1054_s4, %s881_s7  ;;  %p885_p2 = scmp.lt.u32.totalorder %s881_s7, %s1054_s4 }
 0x1bb   :  { %p887_p3 = pnand %p885_p2, %p882_p1 }
 0x1bd   :  { %890 = shalt.err (!%p887_p3)
}
 0x1be   :  { %578 = dma.vmem_to_hbm [thread:$0]  %s573_s29, 512, %s1054_s4, [#allocation4], %s899_s27, %s899_s27, %s900_s28  }
 0x1bf   :  { %895 = dma.done.wait [#allocation4], 512  }
 0x1c0   :  { %896 = vsyncadd [#allocation4], 4294966784 }
 0x1c1   :  { %582 = vsyncpa [#allocation3], 1 }
 0x1c2   :  { %583 = vsyncpa [#allocation6], 1 }
 0x1c3   :  { %584 = vsyncpa [#allocation4], 1 }

</bundles_post_ra>
